<compile_context>
chip_gen: v5e
topology: v5e:2x2
jax: 0.10.0
libtpu: 0.0.40
codegen_flags: <defaults>
</compile_context>

<pallas_src>
import jax
import jax.numpy as jnp
from jax.experimental import pallas as pl
from jax.experimental.pallas import tpu as pltpu

B = 1
IN_F = 2048
OUT_F = 1000
OUT_PAD = 1024          # lane-dense (multiple of 128)
N_SPLIT = 8             # 8 OUT blocks of 128 -> DMA/MXU overlap; v7x: 4 steps/TC
OUT_BLK = OUT_PAD // N_SPLIT


def _model_kernel(bounds_ref, x1_ref, w_ref, b_ref, x2_ref, x4_ref, o_ref):
    # Linear slice: (B, IN) bf16  x  (IN, OUT_BLK) bf16 -> (B, OUT_BLK) f32.
    # Weight is already (IN, OUT_PAD) in HBM -> standard contraction, no
    # in-kernel transpose.
    v1 = jax.lax.dot_general(
        x1_ref[...], w_ref[...],
        dimension_numbers=(((1,), (0,)), ((), ())),
        preferred_element_type=jnp.float32,
    )
    v1 = v1 + b_ref[...]

    # The clamp_min/clamp_max/relu6 chain == clip(v1, lo, hi); lo/hi were
    # precomputed in the wrapper and scalar-prefetched into SMEM.
    lo = bounds_ref[0]
    hi = bounds_ref[1]
    v9 = jnp.minimum(jnp.maximum(v1, lo), hi)     # single elementwise pass

    # x3 was folded into x2 in the wrapper: out = (x3*x2)*v9 + x4.
    o_ref[...] = v9 * x2_ref[...] + x4_ref[...]


def prepare_params(w, b):
    """One-time layout prep (outside the per-call path).

    w: (OUT_F, IN_F) f32, b: (OUT_F,) f32
      -> w_t:  (IN_F, OUT_PAD) bf16   (pre-transposed, lane-dense padded)
         b_pad:(1, OUT_PAD)   f32     (added to the f32 accumulator)
    """
    w_t = (
        jnp.zeros((IN_F, OUT_PAD), jnp.bfloat16)
        .at[:, :OUT_F]
        .set(w.T.astype(jnp.bfloat16))
    )
    b_pad = jnp.zeros((1, OUT_PAD), jnp.float32).at[0, :OUT_F].set(b)
    return w_t, b_pad


@jax.jit
def model_forward(x1, x2, x3, x4, w_t, b_pad, k_vals):
    """x1:(B,IN) x2:(B,OUT_F) x3:(1,) x4:(B,OUT_F)
    w_t:(IN,OUT_PAD) bf16  b_pad:(1,OUT_PAD) f32  k_vals:(8,) int32"""
    pad = OUT_PAD - OUT_F

    # Fold x3 into x2 (v11 = x3*(v9*x2)+x4 = v9*(x3*x2)+x4); tiny per-call pads.
    x2p = jnp.pad(x2 * x3, ((0, 0), (0, pad)))
    x4p = jnp.pad(x4, ((0, 0), (0, pad)))
    x1b = x1.astype(jnp.bfloat16)

    # Collapse the monotone clamp chain to a single [lo, hi] once per call.
    kf = k_vals.astype(jnp.float32)

    def chain(v):
        v = jnp.maximum(v, kf[0])     # clamp_min k1
        v = jnp.minimum(v, kf[1])     # clamp_max k2
        v = jnp.maximum(v, kf[2])     # clamp_min k3
        v = jnp.clip(v, 0.0, 6.0)     # relu6
        v = jnp.maximum(v, kf[4])     # clamp_min k5
        v = jnp.clip(v, 0.0, 6.0)     # relu6
        v = jnp.maximum(v, kf[6])     # clamp_min k7
        v = jnp.clip(v, 0.0, 6.0)     # relu6
        return v

    lo = chain(jnp.float32(-jnp.inf))
    hi = chain(jnp.float32(jnp.inf))
    bounds = jnp.stack([lo, hi]).astype(jnp.float32)   # (2,) -> SMEM prefetch

    out = pl.pallas_call(
        _model_kernel,
        out_shape=jax.ShapeDtypeStruct((B, OUT_PAD), jnp.float32),
        grid_spec=pltpu.PrefetchScalarGridSpec(
            num_scalar_prefetch=1,                                    # bounds -> SMEM
            grid=(N_SPLIT,),
            in_specs=[
                pl.BlockSpec((B, IN_F), lambda i, bnd: (0, 0)),       # x1 (bf16)
                pl.BlockSpec((IN_F, OUT_BLK), lambda i, bnd: (0, i)), # w_t (bf16)
                pl.BlockSpec((B, OUT_BLK), lambda i, bnd: (0, i)),    # bias (f32)
                pl.BlockSpec((B, OUT_BLK), lambda i, bnd: (0, i)),    # x2*x3
                pl.BlockSpec((B, OUT_BLK), lambda i, bnd: (0, i)),    # x4
            ],
            out_specs=pl.BlockSpec((B, OUT_BLK), lambda i, bnd: (0, i)),
        ),
        compiler_params=pltpu.CompilerParams(
            dimension_semantics=("parallel",),
            vmem_limit_bytes=8 << 20,
        ),
    )(bounds, x1b, w_t, b_pad, x2p, x4p)
    return out[:, :OUT_F]


def _reference_quantized(x1, x2, x3, x4, w_t, b_pad, k_vals):
    """Pure-JAX reference using the SAME bf16-quantized params the kernel sees."""
    x1b = x1.astype(jnp.bfloat16).astype(jnp.float32)
    wq = w_t[:, :OUT_F].astype(jnp.float32)             # (IN, OUT_F)
    b = b_pad[0, :OUT_F]
    v1 = x1b @ wq + b
    kf = k_vals.astype(jnp.float32)
    v = jnp.maximum(v1, kf[0])
    v = jnp.minimum(v, kf[1])
    v = jnp.maximum(v, kf[2])
    v = jnp.clip(v, 0.0, 6.0)
    v = jnp.maximum(v, kf[4])
    v = jnp.clip(v, 0.0, 6.0)
    v = jnp.maximum(v, kf[6])
    v = jnp.clip(v, 0.0, 6.0)
    v = v * x2
    return x3 * v + x4


if __name__ == "__main__":
    key = jax.random.PRNGKey(0)
    k_x1, k_x2, k_x3, k_x4, k_w, k_b, k_k1, k_k2 = jax.random.split(key, 8)

    # Inputs (shapes implied by the module).
    x1 = jax.random.normal(k_x1, (B, IN_F), dtype=jnp.float32)
    x2 = jax.random.normal(k_x2, (B, OUT_F), dtype=jnp.float32)
    x3 = jax.random.normal(k_x3, (1,), dtype=jnp.float32)
    x4 = jax.random.normal(k_x4, (B, OUT_F), dtype=jnp.float32)

    # Deterministic Linear(2048, 1000) params (PyTorch-style uniform init).
    bound = 1.0 / (IN_F ** 0.5)
    w = jax.random.uniform(k_w, (OUT_F, IN_F), jnp.float32, -bound, bound)
    b = jax.random.uniform(k_b, (OUT_F,), jnp.float32, -bound, bound)

    # Deterministic stand-ins for the torch.randint bounds k1..k8.
    k1 = jax.random.randint(k_k1, (1,), -7, 7, dtype=jnp.int32)
    k_rest = jax.random.randint(k_k2, (7,), -128, 128, dtype=jnp.int32)
    k_vals = jnp.concatenate([k1, k_rest]).astype(jnp.int32)  # (8,)

    # One-time parameter layout prep: bf16 cast + transpose + pad, done once.
    w_t, b_pad = prepare_params(w, b)
    w_t, b_pad = jax.block_until_ready((w_t, b_pad))

    out = model_forward(x1, x2, x3, x4, w_t, b_pad, k_vals)
    out = jax.block_until_ready(out)

    ref = _reference_quantized(x1, x2, x3, x4, w_t, b_pad, k_vals)
    assert out.shape == (B, OUT_F)
    assert jnp.allclose(out, ref, atol=1e-2, rtol=1e-2), "mismatch vs reference"

    print("KERNEL_OK")
</pallas_src>

<mosaic_0001>
module attributes {stable_mosaic.version = 11 : i64} {
  func.func @_model_kernel(%arg0: i32, %arg1: memref<2xf32, #tpu.memory_space<smem>>, %arg2: memref<1x2048xbf16, #tpu.memory_space<vmem>>, %arg3: memref<2048x128xbf16, #tpu.memory_space<vmem>>, %arg4: memref<1x128xf32, #tpu.memory_space<vmem>>, %arg5: memref<1x128xf32, #tpu.memory_space<vmem>>, %arg6: memref<1x128xf32, #tpu.memory_space<vmem>>, %arg7: memref<1x128xf32, #tpu.memory_space<vmem>>) attributes {dimension_semantics = [#tpu.dimension_semantics<parallel>], iteration_bounds = array<i64: 8>, scalar_prefetch = 1 : i64, scratch_operands = 0 : i64, tpu.core_type = #tpu.core_type<tc>, window_params = [{pipeline_mode = #tpu.pipeline_mode<synchronous>, transform_indices = @transform_0, window_bounds = array<i64: 1, 2048>}, {transform_indices = @transform_1, window_bounds = array<i64: 2048, 128>}, {transform_indices = @transform_2, window_bounds = array<i64: 1, 128>}, {transform_indices = @transform_3, window_bounds = array<i64: 1, 128>}, {transform_indices = @transform_4, window_bounds = array<i64: 1, 128>}, {transform_indices = @transform_5, window_bounds = array<i64: 1, 128>}]} {
    %c0 = arith.constant 0 : index
    %c0_0 = arith.constant 0 : index
    %0 = vector.load %arg2[%c0, %c0_0] : memref<1x2048xbf16, #tpu.memory_space<vmem>>, vector<1x2048xbf16>
    %c0_1 = arith.constant 0 : index
    %c0_2 = arith.constant 0 : index
    %1 = vector.load %arg3[%c0_1, %c0_2] : memref<2048x128xbf16, #tpu.memory_space<vmem>>, vector<2048x128xbf16>
    %cst = arith.constant dense<0.000000e+00> : vector<1x128xf32>
    %2 = tpu.matmul %0, %1, %cst {dimension_numbers = #tpu.dot_dimension_numbers<[1], [0], [0], [1], [0, 0, 1, 1], [], []>} : vector<1x2048xbf16>, vector<2048x128xbf16>, vector<1x128xf32> -> vector<1x128xf32>
    %c0_3 = arith.constant 0 : index
    %c0_4 = arith.constant 0 : index
    %3 = vector.load %arg4[%c0_3, %c0_4] : memref<1x128xf32, #tpu.memory_space<vmem>>, vector<1x128xf32>
    %4 = arith.addf %2, %3 : vector<1x128xf32>
    %c0_5 = arith.constant 0 : index
    %5 = memref.load %arg1[%c0_5] : memref<2xf32, #tpu.memory_space<smem>>
    %c1 = arith.constant 1 : index
    %6 = memref.load %arg1[%c1] : memref<2xf32, #tpu.memory_space<smem>>
    %7 = vector.broadcast %5 : f32 to vector<1x128xf32>
    %8 = arith.maximumf %4, %7 : vector<1x128xf32>
    %9 = vector.broadcast %6 : f32 to vector<1x128xf32>
    %10 = arith.minimumf %8, %9 : vector<1x128xf32>
    %c0_6 = arith.constant 0 : index
    %c0_7 = arith.constant 0 : index
    %11 = vector.load %arg5[%c0_6, %c0_7] : memref<1x128xf32, #tpu.memory_space<vmem>>, vector<1x128xf32>
    %12 = arith.mulf %10, %11 : vector<1x128xf32>
    %c0_8 = arith.constant 0 : index
    %c0_9 = arith.constant 0 : index
    %13 = vector.load %arg6[%c0_8, %c0_9] : memref<1x128xf32, #tpu.memory_space<vmem>>, vector<1x128xf32>
    %14 = arith.addf %12, %13 : vector<1x128xf32>
    %c0_10 = arith.constant 0 : index
    %c0_11 = arith.constant 0 : index
    %15 = vector.load %arg7[%c0_10, %c0_11] : memref<1x128xf32, #tpu.memory_space<vmem>>, vector<1x128xf32>
    tpu.vector_store %arg7[%c0_10, %c0_11], %14 {strides = array<i32>} : memref<1x128xf32, #tpu.memory_space<vmem>>, vector<1x128xf32>,
    return
  }
  func.func @transform_0(%arg0: i32, %arg1: memref<2xf32, #tpu.memory_space<smem>>) -> (i32, i32) {
    %c0_i32 = arith.constant 0 : i32
    %c0_i32_0 = arith.constant 0 : i32
    %c0_i32_1 = arith.constant 0 : i32
    return %c0_i32, %c0_i32_0 : i32, i32
  }
  func.func @transform_1(%arg0: i32, %arg1: memref<2xf32, #tpu.memory_space<smem>>) -> (i32, i32) {
    %c0_i32 = arith.constant 0 : i32
    %c0_i32_0 = arith.constant 0 : i32
    return %c0_i32, %arg0 : i32, i32
  }
  func.func @transform_2(%arg0: i32, %arg1: memref<2xf32, #tpu.memory_space<smem>>) -> (i32, i32) {
    %c0_i32 = arith.constant 0 : i32
    %c0_i32_0 = arith.constant 0 : i32
    return %c0_i32, %arg0 : i32, i32
  }
  func.func @transform_3(%arg0: i32, %arg1: memref<2xf32, #tpu.memory_space<smem>>) -> (i32, i32) {
    %c0_i32 = arith.constant 0 : i32
    %c0_i32_0 = arith.constant 0 : i32
    return %c0_i32, %arg0 : i32, i32
  }
  func.func @transform_4(%arg0: i32, %arg1: memref<2xf32, #tpu.memory_space<smem>>) -> (i32, i32) {
    %c0_i32 = arith.constant 0 : i32
    %c0_i32_0 = arith.constant 0 : i32
    return %c0_i32, %arg0 : i32, i32
  }
  func.func @transform_5(%arg0: i32, %arg1: memref<2xf32, #tpu.memory_space<smem>>) -> (i32, i32) {
    %c0_i32 = arith.constant 0 : i32
    %c0_i32_0 = arith.constant 0 : i32
    return %c0_i32, %arg0 : i32, i32
  }
}

</mosaic_0001>

<bundles_post_ra>
// kernel: model_forward.1
= control target key start
LH: loop header
LB: loop body
LE: loop exit
PB: predicated region body
PF: predicated region fallthrough
CT: control target
= control target key end

     0   :  { %s2564_s24 = smov [#allocation3]   ;;  %s2912_s0 = inlined_call_operand.vmem [shape: f32[2], index: 0, kind: input, shape index: {}]   ;;  %s2913_s1 = inlined_call_operand.vmem [shape: bf16[1,2048], index: 1, kind: input, shape index: {}]   ;;  %s2914_s2 = inlined_call_operand.hbm [shape: bf16[2048,1024], index: 2, kind: input, shape index: {}]   ;;  %s2915_s3 = inlined_call_operand.hbm [shape: f32[1,1024], index: 3, kind: input, shape index: {}]   ;;  %s2916_s4 = inlined_call_operand.vmem [shape: f32[1,1024], index: 4, kind: input, shape index: {}]   ;;  %s2917_s5 = inlined_call_operand.vmem [shape: f32[1,1024], index: 5, kind: input, shape index: {}]   ;;  %s2918_s6 = inlined_call_operand.hbm [shape: f32[1,1024], index: 6, kind: output, shape index: {}]  }
   0x1   :  { %2920 = sst [smem:[#allocation16_spill]] %s2914_s2  ;;  %s12_s23 = sshll.u32 %s2912_s0, 4  ;;  %s13_s23 = int_to_ptr.vmem [resolvable:$true] %s12_s23 }
   0x2   :  { %15 = dma.vmem_to_smem %s13_s23, 16, %s2564_s24, [#allocation2] }
   0x3   :  { %2534 = dma.done.wait [#allocation2], 16 }
   0x4   :  { %2535 = vsyncadd [#allocation2], 4294967280 }
   0x5   :  { %18 = sfence }
   0x6   :  { %19 = vsyncpa [#allocation5], 0 }
   0x7   :  { %21 = vsyncpa [#allocation5 + $0x1], 0 }
   0x8   :  { %22 = vsyncpa [#allocation8], 0 }
   0x9   :  { %24 = vsyncpa [#allocation8 + $0x1], 0 }
   0xa   :  { %25 = vsyncpa [#allocation6], 0 }
   0xb   :  { %27 = vsyncpa [#allocation6 + $0x1], 0  ;;  %s2606_s25 = smov 0   ;;  %s2608_s26 = smov 0  }
   0xc   :  { %s2610_s27 = smov 0   ;;  %s2612_s28 = smov 0  }
   0xd LB: > { %2921 = sst [smem:[#allocation14_spill]] %s2558_s27  ;;  %s2627_s0 = sadd.s32 4294967295, %s2562_s28   ;;  %s2562_s28 = sphi %s2612_s28, %s2934_s28   ;;  %s2558_s27 = sphi %s2610_s27, %s2931_s27   ;;  %s2554_s26 = sphi %s2608_s26, %s2933_s26   ;;  %s2550_s25 = sphi %s2606_s25, %s2932_s25  }
   0xe   : > { %s1713_s29 = sadd.s32 4294967294, %s2562_s28   ;;  %s2631_s30 = sadd.s32 1, %s2562_s28  }
   0xf   : > { %s61_s7 = sadd.s32 1, %s2558_s27  ;;  %s58_s8 = ssub.s32 %s2562_s28, %s2631_s30 }
  0x10   : > { %p68_p0 = scmp.ne.s32.totalorder %s2558_s27, %s2554_s26  ;;  %p59_p1 = scmp.eq.s32.totalorder %s58_s8, 0 }
  0x11   : > { %p69_p2 = scmp.eq.s32.totalorder %s2562_s28, 0  ;;  %p74_p3 = scmp.ne.s32.totalorder %s2554_s26, %s2550_s25 }
  0x12   : > { %p75_p4 = scmp.eq.s32.totalorder %s2627_s0, 0  ;;  %p176_p7 = scmp.eq.s32.totalorder %s2627_s0, 7 }
  0x13   : > { %s2643_s9 = scalar_select %p59_p1, %s2558_s27, %s61_s7  }
  0x14   : > { %p2645_p5 = por %p69_p2, %p68_p0  ;;  %p2649_p6 = por %p75_p4, %p74_p3 }
  0x15   : > { %2922 = sst [smem:[#allocation15_spill]] %s2643_s9  ;;  %p182_p8 = scmp.eq.s32.totalorder %s1713_s29, 7 }
  0x16   : > { %p2380_p9 = scmp.lt.s32.totalorder %s2562_s28, 8  ;;  %p2655_p10 = por %p176_p7, %p68_p0 }
  0x17   : > { %p2659_p11 = por %p182_p8, %p74_p3  ;;  %s2664_s14 = sand.u32 1, %s2558_s27  }
  0x18   : > { %s1717_s15 = sshll.u32 %s2562_s28, 2  ;;  %s1716_s16 = sshll.u32 %s2664_s14, 10 }
  0x19   : > { %s2927_s2 = sld [smem:[#allocation16_spill]]  ;;  %s209_s21 = scalar_lea.vmem [#allocation4], %s1716_s16 }
  0x1a   : > { %s216_s22 = sshll.u32 %s209_s21, 4  ;;  %p2673_p12 = pnand %p2380_p9, %p2645_p5  ;;  %s217_s22 = int_to_ptr.vmem [resolvable:$true] %s216_s22 }
  0x1b   : > { %p1718_p13 = scmp.ge.s32.totalorder %s2562_s28, 1  ;;  %s206_s24 = scalar_lea.sflag [#allocation5], %s2664_s14 }
  0x1c   : > { %p2434_p1 = pneg %p2673_p12 }
  0x1f   : > { %s213_s19 = scalar_lea.hbm %s2927_s2, %s1717_s15  ;;  %s2437_s15 = scalar_lea.hbm %s2927_s2, 8192 }
  0x20   : > { %s214_s20 = sshll.u32 %s213_s19, 4  ;;  %s215_s20 = int_to_ptr.hbm [resolvable:$true] %s214_s20 }
  0x21   : > { %s2430_s29 = sshra.s32 %s215_s20, 4  ;;  %s2431_s29 = int_to_ptr.hbm [resolvable:$true] %s2430_s29 }
  0x22   : > { %s2432_s7 = scalar_lea.hbm %s2431_s29, 1024  ;;  %p2438_p4 = scmp.lt.s32.totalorder %s2431_s29, %s2927_s2 }
  0x23   : > { %p2433_p0 = scmp.ne.s32.totalorder %s2431_s29, %s2432_s7  ;;  %p2439_p5 = scmp.lt.s32.totalorder %s2437_s15, %s2432_s7 }
  0x25   : > { %p2435_p2 = pnand %p2434_p1, %p2433_p0  ;;  %p2440_p7 = por %p2439_p5, %p2438_p4 }
  0x27   : > { %p2436_p3 = pneg %p2435_p2 }
  0x29   : > { %p2441_p8 = pnand %p2440_p7, %p2436_p3 }
  0x2b   : > { %2444 = shalt.err (!%p2441_p8)
}
  0x2c   : > { %s2565_s18 = smov 512   ;;  %s2566_s19 = smov 64  }
  0x2d   : > { %s2567_s21 = smov 4   ;;  %p253_p9 = scmp.lt.s32.totalorder %s2562_s28, 9 }
  0x2e   : > { %2372 = dma.hbm_to_vmem [thread:$0]  (!%p2673_p12), %s215_s20, 16384, %s217_s22, %s206_s24, %s2565_s18, %s2566_s19, %s2567_s21  }
  0x2f   : > { %s232_s29 = scalar_lea.hbm %s2915_s3, %s2562_s28  ;;  %p2699_p0 = pnand %p1718_p13, %p253_p9 }
  0x30   : > { %s234_s15 = sshll.u32 %s232_s29, 4  ;;  %s229_s16 = scalar_lea.vmem [#allocation7], %s2664_s14  ;;  %s235_s15 = int_to_ptr.hbm [resolvable:$true] %s234_s15 }
  0x31   : > { %s236_s17 = sshll.u32 %s229_s16, 4  ;;  %s227_s2 = scalar_lea.sflag [#allocation8], %s2664_s14  ;;  %s237_s17 = int_to_ptr.vmem [resolvable:$true] %s236_s17 }
  0x32   : > { %s2460_s9 = sshra.s32 %s235_s15, 4  ;;  %s2467_s24 = scalar_lea.hbm %s2915_s3, 8  ;;  %s2461_s9 = int_to_ptr.hbm [resolvable:$true] %s2460_s9 }
  0x33   : > { %s2462_s27 = scalar_lea.hbm %s2461_s9, 1  ;;  %p2468_p13 = scmp.lt.s32.totalorder %s2461_s9, %s2915_s3 }
  0x34   : > { %p2463_p2 = scmp.ne.s32.totalorder %s2461_s9, %s2462_s27  ;;  %p2469_p5 = scmp.lt.s32.totalorder %s2467_s24, %s2462_s27 }
  0x36   : > { %p2465_p3 = pnand %p2463_p2, %p2434_p1  ;;  %p2470_p7 = por %p2469_p5, %p2468_p13 }
  0x38   : > { %p2466_p4 = pneg %p2465_p3 }
  0x3a   : > { %p2471_p8 = pnand %p2470_p7, %p2466_p4 }
  0x3c   : > { %2474 = shalt.err (!%p2471_p8)
}
  0x3d   : > { %2375 = dma.hbm_to_vmem [thread:$0]  (!%p2673_p12), %s235_s15, 16, %s237_s17, %s227_s2  }
  0x3e   : > { %257 = sbr.rel (%p2699_p0) target bundleno = 347 (0x15b), region = 40  ;;  %s2719_s14 = sand.u32 (!%p2699_p0), 1, %s2554_s26  }
  0x3f   : > { %s1719_s21 = sshll.u32 (!%p2699_p0), %s2719_s14, 10  ;;  %s260_s8 = scalar_lea.sflag (!%p2699_p0), [#allocation5], %s2719_s14 }
  0x40   : > { %s2723_s10 = scalar_lea.vmem (!%p2699_p0), [#allocation4], %s1719_s21 }
  0x43   : > { %2537 = dma.done.wait (%p2649_p6), %s260_s8, 16384  }
  0x44   : > { %2539 = vsyncadd (%p2649_p6), %s260_s8, 4294950912  ;;  %s270_s2 = scalar_lea.sflag [#allocation8], %s2719_s14  ;;  %s272_s27 = scalar_lea.vmem [#allocation7], %s2719_s14 }
  0x45   : > { %2541 = dma.done.wait (%p2649_p6), %s270_s2, 16  }
  0x46   : > { %2543 = vsyncadd (%p2649_p6), %s270_s2, 4294967280  ;;  %v2242_v0 = vld [vmem:[%s2723_s10 + $0x38] sm:$0xff]  ;;  %v2241_v4 = vld [vmem:[%s2723_s10 + $0x30] sm:$0xff]  ;;  %s1586_s7 = sld [smem:[#allocation3]]  ;;  %p309_p6 = scmp.lt.s32.totalorder %s2627_s0, 7 }
  0x47   : > { %v2250_v1 = vld [vmem:[%s2723_s10 + $0x78] sm:$0xff]  ;;  %1378 = vmatpush.bf16.msra.mxu0 %v2242_v0  ;;  %v2249_v5 = vld [vmem:[%s2723_s10 + $0x70] sm:$0xff]  ;;  %v2240_v8 = vld [vmem:[%s2723_s10 + $0x28] sm:$0xff]  ;;  %s2232_s15 = sld [smem:[#allocation3 + $0x1]]  ;;  %s308_s2 = scalar_lea.vmem [#allocation9], %s2719_s14 }
  0x48   : > { %v2258_v2 = vld [vmem:[%s2723_s10 + $0xb8] sm:$0xff]  ;;  %1391 = vmatpush.bf16.msra.mxu1 %v2250_v1  ;;  %v2257_v6 = vld [vmem:[%s2723_s10 + $0xb0] sm:$0xff]  ;;  %v2248_v9 = vld [vmem:[%s2723_s10 + $0x68] sm:$0xff]  ;;  %s310_s16 = scalar_select %p309_p6, %s2627_s0, 7 }
  0x49   : > { %v2266_v3 = vld [vmem:[%s2723_s10 + $0xf8] sm:$0xff]  ;;  %1404 = vmatpush.bf16.msra.mxu2 %v2258_v2  ;;  %v2265_v7 = vld [vmem:[%s2723_s10 + $0xf0] sm:$0xff]  ;;  %v2256_v10 = vld [vmem:[%s2723_s10 + $0xa8] sm:$0xff]  ;;  %s1598_s11 = scalar_lea.sflag [#allocation6], %s2719_s14 }
  0x4a   : > { %1417 = vmatpush.bf16.msra.mxu3 %v2266_v3  ;;  %v2264_v11 = vld [vmem:[%s2723_s10 + $0xe8] sm:$0xff]  ;;  %v2239_v12 = vld [vmem:[%s2723_s10 + $0x20] sm:$0xff]  ;;  %v2238_v16 = vld [vmem:[%s2723_s10 + $0x18] sm:$0xff]  ;;  %s311_s22 = scalar_lea.vmem %s2916_s4, %s310_s16  ;;  %s314_s19 = scalar_lea.vmem %s2917_s5, %s310_s16 }
  0x4b   : > { %1379 = vmatpush.bf16.msra.mxu0 %v2241_v4  ;;  %v2247_v13 = vld [vmem:[%s2723_s10 + $0x60] sm:$0xff]  ;;  %v2246_v17 = vld [vmem:[%s2723_s10 + $0x58] sm:$0xff]  ;;  %v2237_v21 = vld [vmem:[%s2723_s10 + $0x10] sm:$0xff] }
  0x4c   : > { %1392 = vmatpush.bf16.msra.mxu1 %v2249_v5  ;;  %v2255_v14 = vld [vmem:[%s2723_s10 + $0xa0] sm:$0xff]  ;;  %v2254_v18 = vld [vmem:[%s2723_s10 + $0x98] sm:$0xff]  ;;  %v2245_v22 = vld [vmem:[%s2723_s10 + $0x50] sm:$0xff] }
  0x4d   : > { %1405 = vmatpush.bf16.msra.mxu2 %v2257_v6  ;;  %v2263_v15 = vld [vmem:[%s2723_s10 + $0xe0] sm:$0xff]  ;;  %v2262_v19 = vld [vmem:[%s2723_s10 + $0xd8] sm:$0xff]  ;;  %v2253_v23 = vld [vmem:[%s2723_s10 + $0x90] sm:$0xff] }
  0x4e   : > { %1418 = vmatpush.bf16.msra.mxu3 %v2265_v7  ;;  %v315_v20 = vld [vmem:[%s2913_s1] sm:$0xff]  ;;  %v2261_v24 = vld [vmem:[%s2723_s10 + $0xd0] sm:$0xff]  ;;  %v2236_v25 = vld [vmem:[%s2723_s10 + $0x8] sm:$0xff] }
  0x4f   : > { %1380 = vmatpush.bf16.msra.mxu0 %v2240_v8  ;;  %575 = vst [vmem:[#allocation1] ss:$9 sm:$0xff] %v315_v20  ;;  %v2244_v26 = vld [vmem:[%s2723_s10 + $0x48] sm:$0xff]  ;;  %v2235_v29 = vld [vmem:[%s2723_s10] sm:$0xff]  ;;  %v2274_v33 = vld [vmem:[%s2723_s10 + $0x138] sm:$0xff] }
  0x50   : > { %1393 = vmatpush.bf16.msra.mxu1 %v2248_v9  ;;  %v2252_v27 = vld [vmem:[%s2723_s10 + $0x88] sm:$0xff]  ;;  %v2243_v30 = vld [vmem:[%s2723_s10 + $0x40] sm:$0xff]  ;;  %v2282_v34 = vld [vmem:[%s2723_s10 + $0x178] sm:$0xff] }
  0x51   : > { %1406 = vmatpush.bf16.msra.mxu2 %v2256_v10  ;;  %v2260_v28 = vld [vmem:[%s2723_s10 + $0xc8] sm:$0xff]  ;;  %v2251_v31 = vld [vmem:[%s2723_s10 + $0x80] sm:$0xff]  ;;  %v2290_v35 = vld [vmem:[%s2723_s10 + $0x1b8] sm:$0xff] }
  0x52   : > { %1419 = vmatpush.bf16.msra.mxu3 %v2264_v11  ;;  %v2259_v32 = vld [vmem:[%s2723_s10 + $0xc0] sm:$0xff]  ;;  %v2298_v36 = vld [vmem:[%s2723_s10 + $0x1f8] sm:$0xff]  ;;  %v2273_v37 = vld [vmem:[%s2723_s10 + $0x130] sm:$0xff] }
  0x53   : > { %1381 = vmatpush.bf16.msra.mxu0 %v2239_v12  ;;  %v2281_v40 = vld [vmem:[%s2723_s10 + $0x170] sm:$0xff]  ;;  %v2272_v45 = vld [vmem:[%s2723_s10 + $0x128] sm:$0xff]  ;;  %v2271_v49 = vld [vmem:[%s2723_s10 + $0x120] sm:$0xff] }
  0x54   : > { %1394 = vmatpush.bf16.msra.mxu1 %v2247_v13  ;;  %v2289_v43 = vld [vmem:[%s2723_s10 + $0x1b0] sm:$0xff]  ;;  %v2280_v46 = vld [vmem:[%s2723_s10 + $0x168] sm:$0xff]  ;;  %v2279_v50 = vld [vmem:[%s2723_s10 + $0x160] sm:$0xff] }
  0x55   : > { %1407 = vmatpush.bf16.msra.mxu2 %v2255_v14  ;;  %v2297_v44 = vld [vmem:[%s2723_s10 + $0x1f0] sm:$0xff]  ;;  %v2288_v47 = vld [vmem:[%s2723_s10 + $0x1a8] sm:$0xff]  ;;  %v316_v52 = vld [vmem:[%s2913_s1 + $0x8] sm:$0xff] }
  0x56   : > { %1420 = vmatpush.bf16.msra.mxu3 %v2263_v15  ;;  %v578_v38 = vld [vmem:[#allocation1 + $0x12] sm:$0xff]  ;;  %v576_v39 = vld [vmem:[#allocation1] sm:$0xff]  ;;  %v577_v42 = vld [vmem:[#allocation1 + $0x9] sm:$0xff] }
  0x57   : > { %1382 = vmatpush.bf16.msra.mxu0 %v2238_v16  ;;  %v579_v41 = vld [vmem:[#allocation1 + $0x1b] sm:$0xff]  ;;  %v2296_v48 = vld [vmem:[%s2723_s10 + $0x1e8] sm:$0xff]  ;;  %v580_v53 = vld [vmem:[#allocation1 + $0x24] sm:$0xff] }
  0x58   : > { %1395 = vmatpush.bf16.msra.mxu1 %v2246_v17  ;;  %v582_v51 = vld [vmem:[#allocation1 + $0x36] sm:$0xff]  ;;  %v583_v54 = vld [vmem:[#allocation1 + $0x3f] sm:$0xff]  ;;  %v581_v55 = vld [vmem:[#allocation1 + $0x2d] sm:$0xff] }
  0x59   : > { %1408 = vmatpush.bf16.msra.mxu2 %v2254_v18  ;;  %v2287_v56 = vld [vmem:[%s2723_s10 + $0x1a0] sm:$0xff]  ;;  %585 = vst [vmem:[#allocation1] ss:$9 sm:$0xff] %v316_v52  ;;  %v2270_v58 = vld [vmem:[%s2723_s10 + $0x118] sm:$0xff]  ;;  %v2269_v62 = vld [vmem:[%s2723_s10 + $0x110] sm:$0xff] }
  0x5a   : > { %1421 = vmatpush.bf16.msra.mxu3 %v2262_v19  ;;  %v2295_v57 = vld [vmem:[%s2723_s10 + $0x1e0] sm:$0xff]  ;;  %v2278_v59 = vld [vmem:[%s2723_s10 + $0x158] sm:$0xff]  ;;  %v2277_v63 = vld [vmem:[%s2723_s10 + $0x150] sm:$0xff] }
  0x5b   : > { %1383 = vmatpush.bf16.msra.mxu0 %v2237_v21  ;;  %v2286_v60 = vld [vmem:[%s2723_s10 + $0x198] sm:$0xff]  ;;  %v2285_v0 = vld [vmem:[%s2723_s10 + $0x190] sm:$0xff]  ;;  %v2268_v2 = vld [vmem:[%s2723_s10 + $0x108] sm:$0xff] }
  0x5c   : > { %1396 = vmatpush.bf16.msra.mxu1 %v2245_v22  ;;  %v2294_v61 = vld [vmem:[%s2723_s10 + $0x1d8] sm:$0xff]  ;;  %v2293_v1 = vld [vmem:[%s2723_s10 + $0x1d0] sm:$0xff]  ;;  %v2276_v3 = vld [vmem:[%s2723_s10 + $0x148] sm:$0xff] }
  0x5d   : > { %1409 = vmatpush.bf16.msra.mxu2 %v2253_v23  ;;  %v2284_v4 = vld [vmem:[%s2723_s10 + $0x188] sm:$0xff]  ;;  %v2267_v6 = vld [vmem:[%s2723_s10 + $0x100] sm:$0xff]  ;;  %v2306_v10 = vld [vmem:[%s2723_s10 + $0x238] sm:$0xff] }
  0x5e   : > { %1422 = vmatpush.bf16.msra.mxu3 %v2261_v24  ;;  %v2292_v5 = vld [vmem:[%s2723_s10 + $0x1c8] sm:$0xff]  ;;  %v2275_v7 = vld [vmem:[%s2723_s10 + $0x140] sm:$0xff]  ;;  %v2314_v11 = vld [vmem:[%s2723_s10 + $0x278] sm:$0xff] }
  0x5f   : > { %1384 = vmatpush.bf16.msra.mxu0 %v2236_v25  ;;  %v2283_v8 = vld [vmem:[%s2723_s10 + $0x180] sm:$0xff]  ;;  %v2322_v12 = vld [vmem:[%s2723_s10 + $0x2b8] sm:$0xff]  ;;  %v2305_v14 = vld [vmem:[%s2723_s10 + $0x230] sm:$0xff] }
  0x60   : > { %1397 = vmatpush.bf16.msra.mxu1 %v2244_v26  ;;  %v2291_v9 = vld [vmem:[%s2723_s10 + $0x1c0] sm:$0xff]  ;;  %v2330_v13 = vld [vmem:[%s2723_s10 + $0x2f8] sm:$0xff]  ;;  %v2313_v15 = vld [vmem:[%s2723_s10 + $0x270] sm:$0xff] }
  0x61   : > { %1410 = vmatpush.bf16.msra.mxu2 %v2252_v27  ;;  %v2321_v16 = vld [vmem:[%s2723_s10 + $0x2b0] sm:$0xff]  ;;  %v2304_v18 = vld [vmem:[%s2723_s10 + $0x228] sm:$0xff]  ;;  %v2303_v22 = vld [vmem:[%s2723_s10 + $0x220] sm:$0xff] }
  0x62   : > { %1423 = vmatpush.bf16.msra.mxu3 %v2260_v28  ;;  %v2329_v17 = vld [vmem:[%s2723_s10 + $0x2f0] sm:$0xff]  ;;  %v2312_v19 = vld [vmem:[%s2723_s10 + $0x268] sm:$0xff]  ;;  %v2311_v23 = vld [vmem:[%s2723_s10 + $0x260] sm:$0xff] }
  0x63   : > { %1385 = vmatpush.bf16.msra.mxu0 %v2235_v29  ;;  %v2320_v20 = vld [vmem:[%s2723_s10 + $0x2a8] sm:$0xff]  ;;  %v2319_v24 = vld [vmem:[%s2723_s10 + $0x2a0] sm:$0xff]  ;;  %v2302_v26 = vld [vmem:[%s2723_s10 + $0x218] sm:$0xff] }
  0x64   : > { %1398 = vmatpush.bf16.msra.mxu1 %v2243_v30  ;;  %v2328_v21 = vld [vmem:[%s2723_s10 + $0x2e8] sm:$0xff]  ;;  %v2327_v25 = vld [vmem:[%s2723_s10 + $0x2e0] sm:$0xff]  ;;  %v2310_v27 = vld [vmem:[%s2723_s10 + $0x258] sm:$0xff] }
  0x65   : > { %1411 = vmatpush.bf16.msra.mxu2 %v2251_v31  ;;  %v2318_v28 = vld [vmem:[%s2723_s10 + $0x298] sm:$0xff]  ;;  %v2301_v30 = vld [vmem:[%s2723_s10 + $0x210] sm:$0xff] }
  0x66   : > { %1424 = vmatpush.bf16.msra.mxu3 %v2259_v32  ;;  %1386 = vmatmul.bf16.vlgmr.msra.gmra.mxu0 %v576_v39  ;;  %v2326_v29 = vld [vmem:[%s2723_s10 + $0x2d8] sm:$0xff]  ;;  %v2309_v31 = vld [vmem:[%s2723_s10 + $0x250] sm:$0xff]  ;;  %v2307_v39 = vld [vmem:[%s2723_s10 + $0x240] sm:$0xff] }
  0x67   : > { %1430 = vmatpush.bf16.msrb.mxu0 %v2274_v33  ;;  %1399 = vmatmul.bf16.vlgmr.msra.gmra.mxu1 %v577_v42  ;;  %v2317_v32 = vld [vmem:[%s2723_s10 + $0x290] sm:$0xff]  ;;  %v2338_v42 = vld [vmem:[%s2723_s10 + $0x338] sm:$0xff] }
  0x68   : > { %1443 = vmatpush.bf16.msrb.mxu1 %v2282_v34  ;;  %1412 = vmatmul.bf16.vlgmr.msra.gmra.mxu2 %v578_v38  ;;  %v2325_v33 = vld [vmem:[%s2723_s10 + $0x2d0] sm:$0xff]  ;;  %v2300_v34 = vld [vmem:[%s2723_s10 + $0x208] sm:$0xff]  ;;  %v2299_v38 = vld [vmem:[%s2723_s10 + $0x200] sm:$0xff] }
  0x69   : > { %1456 = vmatpush.bf16.msrb.mxu2 %v2290_v35  ;;  %1425 = vmatmul.bf16.vlgmr.msra.gmra.mxu3 %v579_v41  ;;  %v2308_v35 = vld [vmem:[%s2723_s10 + $0x248] sm:$0xff]  ;;  %v2323_v41 = vld [vmem:[%s2723_s10 + $0x2c0] sm:$0xff]  ;;  %v2353_v52 = vld [vmem:[%s2723_s10 + $0x3b0] sm:$0xff] }
  0x6a   : > { %1469 = vmatpush.bf16.msrb.mxu3 %v2298_v36  ;;  %v2316_v36 = vld [vmem:[%s2723_s10 + $0x288] sm:$0xff] }
  0x6b   : > { %1431 = vmatpush.bf16.msrb.mxu0 %v2273_v37  ;;  %v2324_v37 = vld [vmem:[%s2723_s10 + $0x2c8] sm:$0xff] }
  0x6c   : > { %1444 = vmatpush.bf16.msrb.mxu1 %v2281_v40  ;;  %v2315_v40 = vld [vmem:[%s2723_s10 + $0x280] sm:$0xff] }
  0x6d   : > { %1457 = vmatpush.bf16.msrb.mxu2 %v2289_v43  ;;  %v2346_v43 = vld [vmem:[%s2723_s10 + $0x378] sm:$0xff] }
  0x6e   : > { %1470 = vmatpush.bf16.msrb.mxu3 %v2297_v44  ;;  %v2354_v44 = vld [vmem:[%s2723_s10 + $0x3b8] sm:$0xff] }
  0x6f   : > { %1432 = vmatpush.bf16.msrb.mxu0 %v2272_v45  ;;  %v2362_v45 = vld [vmem:[%s2723_s10 + $0x3f8] sm:$0xff] }
  0x70   : > { %1445 = vmatpush.bf16.msrb.mxu1 %v2280_v46  ;;  %v586_v46 = vld [vmem:[#allocation1] sm:$0xff] }
  0x71   : > { %1458 = vmatpush.bf16.msrb.mxu2 %v2288_v47  ;;  %v588_v47 = vld [vmem:[#allocation1 + $0x12] sm:$0xff] }
  0x72   : > { %1471 = vmatpush.bf16.msrb.mxu3 %v2296_v48  ;;  %v587_v48 = vld [vmem:[#allocation1 + $0x9] sm:$0xff] }
  0x73   : > { %1433 = vmatpush.bf16.msrb.mxu0 %v2271_v49  ;;  %v589_v49 = vld [vmem:[#allocation1 + $0x1b] sm:$0xff] }
  0x74   : > { %1446 = vmatpush.bf16.msrb.mxu1 %v2279_v50  ;;  %v2337_v50 = vld [vmem:[%s2723_s10 + $0x330] sm:$0xff] }
  0x75   : > { %1459 = vmatpush.bf16.msrb.mxu2 %v2287_v56  ;;  %v2352_v56 = vld [vmem:[%s2723_s10 + $0x3a8] sm:$0xff] }
  0x76   : > { %1472 = vmatpush.bf16.msrb.mxu3 %v2295_v57  ;;  %v2360_v57 = vld [vmem:[%s2723_s10 + $0x3e8] sm:$0xff] }
  0x77   : > { %1434 = vmatpush.bf16.msrb.mxu0 %v2270_v58  ;;  %v2335_v58 = vld [vmem:[%s2723_s10 + $0x320] sm:$0xff] }
  0x78   : > { %1447 = vmatpush.bf16.msrb.mxu1 %v2278_v59  ;;  %v2343_v59 = vld [vmem:[%s2723_s10 + $0x360] sm:$0xff] }
  0x79   : > { %1460 = vmatpush.bf16.msrb.mxu2 %v2286_v60  ;;  %v2351_v60 = vld [vmem:[%s2723_s10 + $0x3a0] sm:$0xff] }
  0x7a   : > { %1473 = vmatpush.bf16.msrb.mxu3 %v2294_v61  ;;  %v2359_v61 = vld [vmem:[%s2723_s10 + $0x3e0] sm:$0xff] }
  0x7b   : > { %1435 = vmatpush.bf16.msrb.mxu0 %v2269_v62  ;;  %v2334_v62 = vld [vmem:[%s2723_s10 + $0x318] sm:$0xff] }
  0x7c   : > { %1448 = vmatpush.bf16.msrb.mxu1 %v2277_v63  ;;  %v2342_v63 = vld [vmem:[%s2723_s10 + $0x358] sm:$0xff] }
  0x7d   : > { %1461 = vmatpush.bf16.msrb.mxu2 %v2285_v0  ;;  %v2350_v0 = vld [vmem:[%s2723_s10 + $0x398] sm:$0xff] }
  0x7e   : > { %1474 = vmatpush.bf16.msrb.mxu3 %v2293_v1  ;;  %v2358_v1 = vld [vmem:[%s2723_s10 + $0x3d8] sm:$0xff] }
  0x7f   : > { %1436 = vmatpush.bf16.msrb.mxu0 %v2268_v2  ;;  %v2333_v2 = vld [vmem:[%s2723_s10 + $0x310] sm:$0xff] }
  0x80   : > { %1449 = vmatpush.bf16.msrb.mxu1 %v2276_v3  ;;  %v2341_v3 = vld [vmem:[%s2723_s10 + $0x350] sm:$0xff] }
  0x81   : > { %1462 = vmatpush.bf16.msrb.mxu2 %v2284_v4  ;;  %v2349_v4 = vld [vmem:[%s2723_s10 + $0x390] sm:$0xff] }
  0x82   : > { %1475 = vmatpush.bf16.msrb.mxu3 %v2292_v5  ;;  %v2357_v5 = vld [vmem:[%s2723_s10 + $0x3d0] sm:$0xff] }
  0x83   : > { %1437 = vmatpush.bf16.msrb.mxu0 %v2267_v6  ;;  %v2332_v6 = vld [vmem:[%s2723_s10 + $0x308] sm:$0xff] }
  0x84   : > { %1450 = vmatpush.bf16.msrb.mxu1 %v2275_v7  ;;  %v2340_v7 = vld [vmem:[%s2723_s10 + $0x348] sm:$0xff] }
  0x85   : > { %1463 = vmatpush.bf16.msrb.mxu2 %v2283_v8  ;;  %v2348_v8 = vld [vmem:[%s2723_s10 + $0x388] sm:$0xff] }
  0x86   : > { %1476 = vmatpush.bf16.msrb.mxu3 %v2291_v9  ;;  %1438 = vmatmul.bf16.vlgmr.msrb.gmra.mxu0 %v580_v53  ;;  %v2361_v53 = vld [vmem:[%s2723_s10 + $0x3f0] sm:$0xff]  ;;  %v2356_v9 = vld [vmem:[%s2723_s10 + $0x3c8] sm:$0xff] }
  0x87   : > { %1482 = vmatpush.bf16.msra.mxu0 %v2306_v10  ;;  %1451 = vmatmul.bf16.vlgmr.msrb.gmra.mxu1 %v581_v55  ;;  %v2344_v55 = vld [vmem:[%s2723_s10 + $0x368] sm:$0xff]  ;;  %v2331_v10 = vld [vmem:[%s2723_s10 + $0x300] sm:$0xff] }
  0x88   : > { %1495 = vmatpush.bf16.msra.mxu1 %v2314_v11  ;;  %1464 = vmatmul.bf16.vlgmr.msrb.gmra.mxu2 %v582_v51  ;;  %v2345_v51 = vld [vmem:[%s2723_s10 + $0x370] sm:$0xff]  ;;  %v2339_v11 = vld [vmem:[%s2723_s10 + $0x340] sm:$0xff] }
  0x89   : > { %1508 = vmatpush.bf16.msra.mxu2 %v2322_v12  ;;  %1477 = vmatmul.bf16.vlgmr.msrb.gmra.mxu3 %v583_v54  ;;  %v2336_v54 = vld [vmem:[%s2723_s10 + $0x328] sm:$0xff]  ;;  %v2347_v12 = vld [vmem:[%s2723_s10 + $0x380] sm:$0xff] }
  0x8a   : > { %1521 = vmatpush.bf16.msra.mxu3 %v2330_v13  ;;  %v2355_v13 = vld [vmem:[%s2723_s10 + $0x3c0] sm:$0xff]  ;;  %s1606_s10 = scalar_lea.hbm %s2918_s6, %s2627_s0 }
  0x8b   : > { %1483 = vmatpush.bf16.msra.mxu0 %v2305_v14  ;;  %v590_v14 = vld [vmem:[#allocation1 + $0x24] sm:$0xff]  ;;  %s1610_s9 = sshll.u32 %s1606_s10, 4  ;;  %s1611_s9 = int_to_ptr.hbm [resolvable:$true] %s1610_s9 }
  0x8c   : > { %1496 = vmatpush.bf16.msra.mxu1 %v2313_v15  ;;  %v591_v15 = vld [vmem:[#allocation1 + $0x2d] sm:$0xff]  ;;  %s2504_s23 = sshra.s32 %s1611_s9, 4  ;;  %s2505_s23 = int_to_ptr.hbm [resolvable:$true] %s2504_s23 }
  0x8d   : > { %1509 = vmatpush.bf16.msra.mxu2 %v2321_v16  ;;  %v592_v16 = vld [vmem:[#allocation1 + $0x36] sm:$0xff]  ;;  %s2506_s29 = scalar_lea.hbm %s2505_s23, 1  ;;  %p2511_p0 = scmp.lt.s32.totalorder %s2505_s23, %s2918_s6 }
  0x8e   : > { %1522 = vmatpush.bf16.msra.mxu3 %v2329_v17  ;;  %v593_v17 = vld [vmem:[#allocation1 + $0x3f] sm:$0xff]  ;;  %p2507_p12 = scmp.ne.s32.totalorder %s2505_s23, %s2506_s29 }
  0x8f   : > { %1484 = vmatpush.bf16.msra.mxu0 %v2304_v18  ;;  %v573_v18 = vld [vmem:[%s272_s27] sm:$0x1]  ;;  %s1608_s27 = sshll.u32 %s308_s2, 4  ;;  %s1609_s27 = int_to_ptr.vmem [resolvable:$true] %s1608_s27 }
  0x90   : > { %1497 = vmatpush.bf16.msra.mxu1 %v2312_v19  ;;  %p2508_p1 = pnand %p2507_p12, %p2655_p10 }
  0x91   : > { %1510 = vmatpush.bf16.msra.mxu2 %v2320_v20 }
  0x92   : > { %1523 = vmatpush.bf16.msra.mxu3 %v2328_v21  ;;  %p2509_p9 = pneg %p2508_p1 }
  0x93   : > { %1485 = vmatpush.bf16.msra.mxu0 %v2303_v22 }
  0x94   : > { %1498 = vmatpush.bf16.msra.mxu1 %v2311_v23 }
  0x95   : > { %1511 = vmatpush.bf16.msra.mxu2 %v2319_v24 }
  0x96   : > { %1524 = vmatpush.bf16.msra.mxu3 %v2327_v25 }
  0x97   : > { %1486 = vmatpush.bf16.msra.mxu0 %v2302_v26 }
  0x98   : > { %1499 = vmatpush.bf16.msra.mxu1 %v2310_v27 }
  0x99   : > { %1512 = vmatpush.bf16.msra.mxu2 %v2318_v28 }
  0x9a   : > { %1525 = vmatpush.bf16.msra.mxu3 %v2326_v29 }
  0x9b   : > { %1487 = vmatpush.bf16.msra.mxu0 %v2301_v30 }
  0x9c   : > { %1500 = vmatpush.bf16.msra.mxu1 %v2309_v31 }
  0x9d   : > { %1513 = vmatpush.bf16.msra.mxu2 %v2317_v32 }
  0x9e   : > { %1526 = vmatpush.bf16.msra.mxu3 %v2325_v33 }
  0x9f   : > { %1488 = vmatpush.bf16.msra.mxu0 %v2300_v34 }
  0xa0   : > { %1501 = vmatpush.bf16.msra.mxu1 %v2308_v35 }
  0xa1   : > { %1514 = vmatpush.bf16.msra.mxu2 %v2316_v36 }
  0xa2   : > { %1527 = vmatpush.bf16.msra.mxu3 %v2324_v37 }
  0xa3   : > { %1489 = vmatpush.bf16.msra.mxu0 %v2299_v38 }
  0xa4   : > { %1502 = vmatpush.bf16.msra.mxu1 %v2307_v39 }
  0xa5   : > { %1515 = vmatpush.bf16.msra.mxu2 %v2315_v40 }
  0xa6   : > { %1528 = vmatpush.bf16.msra.mxu3 %v2323_v41  ;;  %1490 = vmatmul.bf16.vlgmr.msra.gmra.mxu0 %v586_v46 }
  0xa7   : > { %1534 = vmatpush.bf16.msrb.mxu0 %v2338_v42  ;;  %1503 = vmatmul.bf16.vlgmr.msra.gmra.mxu1 %v587_v48 }
  0xa8   : > { %1547 = vmatpush.bf16.msrb.mxu1 %v2346_v43  ;;  %1516 = vmatmul.bf16.vlgmr.msra.gmra.mxu2 %v588_v47 }
  0xa9   : > { %1560 = vmatpush.bf16.msrb.mxu2 %v2354_v44  ;;  %1529 = vmatmul.bf16.vlgmr.msra.gmra.mxu3 %v589_v49 }
  0xaa   : > { %1573 = vmatpush.bf16.msrb.mxu3 %v2362_v45 }
  0xab   : > { %1535 = vmatpush.bf16.msrb.mxu0 %v2337_v50 }
  0xac   : > { %1548 = vmatpush.bf16.msrb.mxu1 %v2345_v51 }
  0xad   : > { %1561 = vmatpush.bf16.msrb.mxu2 %v2353_v52 }
  0xae   : > { %1574 = vmatpush.bf16.msrb.mxu3 %v2361_v53 }
  0xaf   : > { %1536 = vmatpush.bf16.msrb.mxu0 %v2336_v54 }
  0xb0   : > { %1549 = vmatpush.bf16.msrb.mxu1 %v2344_v55 }
  0xb1   : > { %1562 = vmatpush.bf16.msrb.mxu2 %v2352_v56 }
  0xb2   : > { %1575 = vmatpush.bf16.msrb.mxu3 %v2360_v57 }
  0xb3   : > { %1537 = vmatpush.bf16.msrb.mxu0 %v2335_v58 }
  0xb4   : > { %1550 = vmatpush.bf16.msrb.mxu1 %v2343_v59 }
  0xb5   : > { %1563 = vmatpush.bf16.msrb.mxu2 %v2351_v60 }
  0xb6   : > { %1576 = vmatpush.bf16.msrb.mxu3 %v2359_v61 }
  0xb7   : > { %1538 = vmatpush.bf16.msrb.mxu0 %v2334_v62 }
  0xb8   : > { %1551 = vmatpush.bf16.msrb.mxu1 %v2342_v63 }
  0xb9   : > { %1564 = vmatpush.bf16.msrb.mxu2 %v2350_v0  ;;  %v1588_v0 = vstv %s1586_s7 }
  0xba   : > { %1577 = vmatpush.bf16.msrb.mxu3 %v2358_v1 }
  0xbb   : > { %1539 = vmatpush.bf16.msrb.mxu0 %v2333_v2  ;;  %v1590_v2 = vstv %s2232_s15  ;;  %s2510_s15 = scalar_lea.hbm %s2918_s6, 8 }
  0xbc   : > { %1552 = vmatpush.bf16.msrb.mxu1 %v2341_v3  ;;  %p2512_p2 = scmp.lt.s32.totalorder %s2510_s15, %s2506_s29 }
  0xbd   : > { %1565 = vmatpush.bf16.msrb.mxu2 %v2349_v4  ;;  %v1592_v4 = vld [vmem:[%s311_s22] sm:$0x1] }
  0xbe   : > { %1578 = vmatpush.bf16.msrb.mxu3 %v2357_v5  ;;  %p2513_p3 = por %p2512_p2, %p2511_p0 }
  0xbf   : > { %1540 = vmatpush.bf16.msrb.mxu0 %v2332_v6  ;;  %v1594_v6 = vld [vmem:[%s314_s19] sm:$0x1] }
  0xc0   : > { %1553 = vmatpush.bf16.msrb.mxu1 %v2340_v7  ;;  %p2514_p4 = pnand %p2513_p3, %p2509_p9 }
  0xc1   : > { %1566 = vmatpush.bf16.msrb.mxu2 %v2348_v8 }
  0xc2   : > { %1579 = vmatpush.bf16.msrb.mxu3 %v2356_v9 }
  0xc3   : > { %1541 = vmatpush.bf16.msrb.mxu0 %v2331_v10 }
  0xc4   : > { %1554 = vmatpush.bf16.msrb.mxu1 %v2339_v11 }
  0xc5   : > { %1567 = vmatpush.bf16.msrb.mxu2 %v2347_v12 }
  0xc6   : > { %1580 = vmatpush.bf16.msrb.mxu3 %v2355_v13  ;;  %1542 = vmatmul.bf16.vlgmr.msrb.gmra.mxu0 %v590_v14 }
  0xc7   : > { %1555 = vmatmul.bf16.vlgmr.msrb.gmra.mxu1 %v591_v15 }
  0xc8   : > { %1568 = vmatmul.bf16.vlgmr.msrb.gmra.mxu2 %v592_v16 }
  0xc9   : > { %1581 = vmatmul.bf16.vlgmr.msrb.gmra.mxu3 %v593_v17 }
  0xe3   : > { %v1387_v19 = vpop.f32.mrf.mxu0 }
  0xe4   : > { %v1388_v20 = vadd.f32 %v1387_v19, %v573_v18  ;;  %v1400_v21 = vpop.f32.mrf.mxu1 }
  0xe6   : > { %v1401_v22 = vadd.f32 %v1400_v21, %v1388_v20 }
  0xeb   : > { %v1413_v23 = vpop.f32.mrf.mxu2  ;;  %v1389_v26 = vpop.f32.mrf.mxu0 }
  0xec   : > { %v1414_v24 = vadd.f32 %v1413_v23, %v1401_v22  ;;  %v1426_v25 = vpop.f32.mrf.mxu3  ;;  %v1402_v28 = vpop.f32.mrf.mxu1 }
  0xee   : > { %v1427_v27 = vadd.f32 %v1426_v25, %v1414_v24 }
  0xf3   : > { %v1415_v29 = vpop.f32.mrf.mxu2 }
  0xf4   : > { %v1428_v30 = vpop.f32.mrf.mxu3 }
 0x103   : > { %v1439_v31 = vpop.f32.mrf.mxu0 }
 0x104   : > { %v1452_v32 = vpop.f32.mrf.mxu1  ;;  %v1440_v41 = vadd.f32 %v1439_v31, %v1427_v27 }
 0x106   : > { %v1453_v45 = vadd.f32 %v1452_v32, %v1440_v41 }
 0x10b   : > { %v1465_v33 = vpop.f32.mrf.mxu2  ;;  %v1441_v35 = vpop.f32.mrf.mxu0 }
 0x10c   : > { %v1478_v34 = vpop.f32.mrf.mxu3  ;;  %v1454_v36 = vpop.f32.mrf.mxu1  ;;  %v1466_v47 = vadd.f32 %v1465_v33, %v1453_v45 }
 0x10e   : > { %v1479_v50 = vadd.f32 %v1478_v34, %v1466_v47 }
 0x113   : > { %v1467_v37 = vpop.f32.mrf.mxu2 }
 0x114   : > { %v1480_v38 = vpop.f32.mrf.mxu3 }
 0x123   : > { %v1491_v39 = vpop.f32.mrf.mxu0 }
 0x124   : > { %v1504_v40 = vpop.f32.mrf.mxu1  ;;  %v1492_v51 = vadd.f32 %v1491_v39, %v1479_v50 }
 0x126   : > { %v1505_v52 = vadd.f32 %v1504_v40, %v1492_v51 }
 0x12b   : > { %v1517_v42 = vpop.f32.mrf.mxu2  ;;  %v1493_v44 = vpop.f32.mrf.mxu0 }
 0x12c   : > { %v1530_v43 = vpop.f32.mrf.mxu3  ;;  %v1506_v46 = vpop.f32.mrf.mxu1  ;;  %v1518_v53 = vadd.f32 %v1517_v42, %v1505_v52 }
 0x12e   : > { %v1531_v54 = vadd.f32 %v1530_v43, %v1518_v53 }
 0x133   : > { %v1519_v48 = vpop.f32.mrf.mxu2 }
 0x134   : > { %v1532_v49 = vpop.f32.mrf.mxu3 }
 0x143   : > { %v1543_v55 = vpop.f32.mrf.mxu0 }
 0x144   : > { %v1556_v56 = vpop.f32.mrf.mxu1  ;;  %v1544_v57 = vadd.f32 %v1543_v55, %v1531_v54 }
 0x146   : > { %v1557_v58 = vadd.f32 %v1556_v56, %v1544_v57 }
 0x14b   : > { %v1569_v59 = vpop.f32.mrf.mxu2  ;;  %v1545_v62 = vpop.f32.mrf.mxu0 }
 0x14c   : > { %v1582_v60 = vpop.f32.mrf.mxu3  ;;  %v1570_v61 = vadd.f32 %v1569_v59, %v1557_v58  ;;  %v1558_v63 = vpop.f32.mrf.mxu1 }
 0x14e   : > { %v1583_v1 = vadd.f32 %v1582_v60, %v1570_v61 }
 0x150   : > { %v1589_v3 = vmax.f32 %v1583_v1, %v1588_v0 }
 0x152   : > { %v1591_v5 = vmin.f32 %v1589_v3, %v1590_v2 }
 0x153   : > { %v1571_v7 = vpop.f32.mrf.mxu2 }
 0x154   : > { %v1584_v8 = vpop.f32.mrf.mxu3  ;;  %v1593_v9 = vmul.f32 %v1592_v4, %v1591_v5 }
 0x156   : > { %v1595_v10 = vadd.f32 %v1594_v6, %v1593_v9 }
 0x158   : > { %1596 = vst [vmem:[%s308_s2] sm:$0x1] %v1595_v10 }
 0x159   : > { %2517 = shalt.err (!%p2514_p4)
}
 0x15a   : > { %2367 = dma.vmem_to_hbm [thread:$0]  (%p2655_p10), %s1609_s27, 16, %s1611_s9, %s1598_s11  }
 0x15b PF: > { %p2381_p13 = scmp.ge.s32.totalorder %s2562_s28, 2  ;;  %s1622_s14 = sand.u32 1, %s2550_s25  }
 0x15c   : > { %s1623_s20 = scalar_lea.sflag [#allocation6], %s1622_s14 }
 0x15d   : > { %p2377_p5 = pnand %p2381_p13, %p2659_p11 }
 0x15f   : > { %p2378_p7 = pneg %p2377_p5 }
 0x161   : > { %2545 = dma.done.wait (%p2378_p7), %s1623_s20, 16  }
 0x162   : > { %2547 = vsyncadd (%p2378_p7), %s1623_s20, 4294967280  ;;  %s2930_s22 = sld [smem:[#allocation14_spill]]  ;;  %p30_p8 = scmp.ge.s32.totalorder %s2631_s30, 10  }
 0x163   : > { %s2931_s27 = sld [smem:[#allocation15_spill]]  ;;  %s2932_s25 = smov %s2554_s26 }
 0x164   : > { %s2934_s28 = smov %s2631_s30  ;;  %32 = sbr.rel (!%p30_p8) target bundleno = 13 (0xd), region = 104 }
 0x168   : > { %s2933_s26 = smov %s2930_s22 }
 0x169   :  { %1628 = vsyncpa [#allocation5], 1 }
 0x16a   :  { %1630 = vsyncpa [#allocation5 + $0x1], 1 }
 0x16b   :  { %1631 = vsyncpa [#allocation8], 1 }
 0x16c   :  { %1633 = vsyncpa [#allocation8 + $0x1], 1 }
 0x16d   :  { %1634 = vsyncpa [#allocation6], 1 }
 0x16e   :  { %1636 = vsyncpa [#allocation6 + $0x1], 1 }

</bundles_post_ra>
